<compile_context>
chip_gen: v5e
topology: v5e:2x2
jax: 0.10.0
libtpu: 0.0.40
codegen_flags: <defaults>
</compile_context>

<pallas_src>
import functools

import jax
import jax.numpy as jnp
from jax.experimental import pallas as pl
from jax.experimental.pallas import tpu as pltpu


def _conv_relu_kernel(x_ref, w_ref, b_ref, o_ref):
    # x_ref: (TH+2, W+2, Cin)  one H-tile of one batch element, halo + zero pad
    # w_ref: (9*Cin, Cout)     3x3 taps flattened into the contraction dim
    # b_ref: (1, Cout)         bias (f32)
    # o_ref: (Cout, TH*W)      lane-dense output tile
    TH = x_ref.shape[0] - 2
    W = x_ref.shape[1] - 2
    cin = x_ref.shape[2]

    x = x_ref[...]

    # im2col: gather the 9 shifted windows once and fuse them into the
    # contraction (lane) axis.  kh shifts are cheap leading-axis offsets; the
    # kw (sublane) shifts are paid once here instead of feeding 9 separate
    # matmuls + VPU accumulation.
    cols = []
    for kh in range(3):
        for kw in range(3):
            cols.append(x[kh:kh + TH, kw:kw + W, :])        # (TH, W, Cin)
    patch = jnp.concatenate(cols, axis=-1)                  # (TH, W, 9*Cin)
    patch = patch.reshape(TH * W, 9 * cin)                  # (TH*W, 9*Cin)

    # Single MXU contraction, f32 accumulation (M=TH*W, K=9*Cin, N=Cout).
    acc = jnp.dot(patch, w_ref[...], preferred_element_type=jnp.float32)

    # f32 epilogue (bias + ReLU) on the VPU, then one small XLU transpose so
    # the store minor dim is TH*W (lane-dense) rather than Cout.
    acc = jnp.maximum(acc + b_ref[...], 0.0)                # (TH*W, Cout)
    o_ref[...] = acc.T.astype(o_ref.dtype)                  # (Cout, TH*W)


def _pick_h_tile(h, target):
    for cand in range(min(h, target), 0, -1):
        if h % cand == 0:
            return cand
    return h


@functools.partial(jax.jit, static_argnames=("th_target", "mxu_dtype"))
def conv_relu(x_nchw, weight, bias, *, th_target=8, mxu_dtype=None):
    """3x3 conv (stride 1, padding 1) + ReLU.  NCHW in / NCHW out."""
    N, Cin, H, W = x_nchw.shape
    Cout = weight.shape[0]
    out_dtype = x_nchw.dtype

    TH = _pick_h_tile(H, th_target)
    nH = H // TH
    THp, Wp = TH + 2, W + 2

    # --- layout glue (no compute); XLA fuses transpose+pad+tile-gather ---
    x_nhwc = jnp.transpose(x_nchw, (0, 2, 3, 1))                    # (N, H, W, Cin)
    x_pad = jnp.pad(x_nhwc, ((0, 0), (1, 1), (1, 1), (0, 0)))       # (N, H+2, W+2, Cin)
    # Overlap-stack H tiles with their 1-row halos so the Pallas grid can use
    # plain Blocked indexing (no overlapping-window BlockSpec needed).
    x_tiles = jnp.stack(
        [x_pad[:, i * TH:i * TH + THp] for i in range(nH)], axis=1)  # (N, nH, TH+2, W+2, Cin)

    w_mat = jnp.transpose(weight, (2, 3, 1, 0)).reshape(9 * Cin, Cout)  # (9*Cin, Cout)
    b2 = bias.astype(jnp.float32).reshape(1, Cout)

    if mxu_dtype is not None:  # bf16 MXU operands for v6e/v7x; accum stays f32
        x_tiles = x_tiles.astype(mxu_dtype)
        w_mat = w_mat.astype(mxu_dtype)

    out = pl.pallas_call(
        _conv_relu_kernel,
        out_shape=jax.ShapeDtypeStruct((N, nH, Cout, TH * W), out_dtype),
        grid=(N, nH),
        in_specs=[
            pl.BlockSpec((None, None, THp, Wp, Cin), lambda n, i: (n, i, 0, 0, 0)),
            pl.BlockSpec((9 * Cin, Cout), lambda n, i: (0, 0)),
            pl.BlockSpec((1, Cout), lambda n, i: (0, 0)),
        ],
        out_specs=pl.BlockSpec((None, None, Cout, TH * W), lambda n, i: (n, i, 0, 0)),
        compiler_params=pltpu.CompilerParams(
            dimension_semantics=("parallel", "parallel")),
    )(x_tiles, w_mat, b2)

    # (N, nH, Cout, TH*W) -> (N, Cout, H, W): single output layout pass.
    out = out.reshape(N, nH, Cout, TH, W)
    out = jnp.transpose(out, (0, 2, 1, 3, 4)).reshape(N, Cout, H, W)
    return out


if __name__ == "__main__":
    key = jax.random.PRNGKey(0)
    kx, kw, kb = jax.random.split(key, 3)

    N, Cin, Cout, H, W = 2, 4, 8, 16, 16
    x = jax.random.normal(kx, (N, Cin, H, W), dtype=jnp.float32)
    weight = jax.random.normal(kw, (Cout, Cin, 3, 3), dtype=jnp.float32) * 0.1
    bias = jax.random.normal(kb, (Cout,), dtype=jnp.float32) * 0.1

    out = jax.block_until_ready(conv_relu(x, weight, bias))

    # Reference: XLA conv with the same semantics as nn.Conv2d(pad=1) + ReLU.
    ref = jax.lax.conv_general_dilated(
        x, weight, window_strides=(1, 1), padding=((1, 1), (1, 1)),
        dimension_numbers=("NCHW", "OIHW", "NCHW"))
    ref = jnp.maximum(ref + bias[None, :, None, None], 0.0)

    assert out.shape == (N, Cout, H, W)
    assert jnp.allclose(out, ref, atol=1e-4, rtol=1e-4)
    print("KERNEL_OK")
</pallas_src>

<mosaic_0001>
module attributes {stable_mosaic.version = 11 : i64} {
  func.func @_conv_relu_kernel(%arg0: i32, %arg1: i32, %arg2: memref<1x1x10x18x4xf32, #tpu.memory_space<vmem>>, %arg3: memref<36x8xf32, #tpu.memory_space<vmem>>, %arg4: memref<1x8xf32, #tpu.memory_space<vmem>>, %arg5: memref<1x1x8x128xf32, #tpu.memory_space<vmem>>) attributes {dimension_semantics = [#tpu.dimension_semantics<parallel>, #tpu.dimension_semantics<parallel>], iteration_bounds = array<i64: 2, 2>, scalar_prefetch = 0 : i64, scratch_operands = 0 : i64, tpu.core_type = #tpu.core_type<tc>, window_params = [{transform_indices = @transform_0, window_bounds = array<i64: 1, 1, 10, 18, 4>}, {pipeline_mode = #tpu.pipeline_mode<synchronous>, transform_indices = @transform_1, window_bounds = array<i64: 36, 8>}, {pipeline_mode = #tpu.pipeline_mode<synchronous>, transform_indices = @transform_2, window_bounds = array<i64: 1, 8>}, {transform_indices = @transform_3, window_bounds = array<i64: 1, 1, 8, 128>}]} {
    %c0 = arith.constant 0 : index
    %c0_0 = arith.constant 0 : index
    %c0_1 = arith.constant 0 : index
    %c0_2 = arith.constant 0 : index
    %c0_3 = arith.constant 0 : index
    %0 = vector.load %arg2[%c0, %c0_0, %c0_1, %c0_2, %c0_3] : memref<1x1x10x18x4xf32, #tpu.memory_space<vmem>>, vector<1x1x10x18x4xf32>
    %1 = vector.shape_cast %0 : vector<1x1x10x18x4xf32> to vector<10x18x4xf32>
    %2 = vector.extract_strided_slice %1 {offsets = [0, 0, 0], sizes = [8, 16, 4], strides = [1, 1, 1]} : vector<10x18x4xf32> to vector<8x16x4xf32>
    %3 = vector.extract_strided_slice %1 {offsets = [0, 1, 0], sizes = [8, 16, 4], strides = [1, 1, 1]} : vector<10x18x4xf32> to vector<8x16x4xf32>
    %4 = vector.extract_strided_slice %1 {offsets = [0, 2, 0], sizes = [8, 16, 4], strides = [1, 1, 1]} : vector<10x18x4xf32> to vector<8x16x4xf32>
    %5 = vector.extract_strided_slice %1 {offsets = [1, 0, 0], sizes = [8, 16, 4], strides = [1, 1, 1]} : vector<10x18x4xf32> to vector<8x16x4xf32>
    %6 = vector.extract_strided_slice %1 {offsets = [1, 1, 0], sizes = [8, 16, 4], strides = [1, 1, 1]} : vector<10x18x4xf32> to vector<8x16x4xf32>
    %7 = vector.extract_strided_slice %1 {offsets = [1, 2, 0], sizes = [8, 16, 4], strides = [1, 1, 1]} : vector<10x18x4xf32> to vector<8x16x4xf32>
    %8 = vector.extract_strided_slice %1 {offsets = [2, 0, 0], sizes = [8, 16, 4], strides = [1, 1, 1]} : vector<10x18x4xf32> to vector<8x16x4xf32>
    %9 = vector.extract_strided_slice %1 {offsets = [2, 1, 0], sizes = [8, 16, 4], strides = [1, 1, 1]} : vector<10x18x4xf32> to vector<8x16x4xf32>
    %10 = vector.extract_strided_slice %1 {offsets = [2, 2, 0], sizes = [8, 16, 4], strides = [1, 1, 1]} : vector<10x18x4xf32> to vector<8x16x4xf32>
    %11 = tpu.concatenate %2, %3, %4, %5, %6, %7, %8, %9, %10 in 2 : vector<8x16x4xf32>, vector<8x16x4xf32>, vector<8x16x4xf32>, vector<8x16x4xf32>, vector<8x16x4xf32>, vector<8x16x4xf32>, vector<8x16x4xf32>, vector<8x16x4xf32>, vector<8x16x4xf32> -> vector<8x16x36xf32>
    %12 = vector.shape_cast %11 : vector<8x16x36xf32> to vector<128x36xf32>
    %c0_4 = arith.constant 0 : index
    %c0_5 = arith.constant 0 : index
    %13 = vector.load %arg3[%c0_4, %c0_5] : memref<36x8xf32, #tpu.memory_space<vmem>>, vector<36x8xf32>
    %cst = arith.constant dense<0.000000e+00> : vector<128x8xf32>
    %14 = tpu.matmul %12, %13, %cst {dimension_numbers = #tpu.dot_dimension_numbers<[1], [0], [0], [1], [0, 0, 1, 1], [], []>} : vector<128x36xf32>, vector<36x8xf32>, vector<128x8xf32> -> vector<128x8xf32>
    %c0_6 = arith.constant 0 : index
    %c0_7 = arith.constant 0 : index
    %15 = vector.load %arg4[%c0_6, %c0_7] : memref<1x8xf32, #tpu.memory_space<vmem>>, vector<1x8xf32>
    %16 = vector.broadcast %15 : vector<1x8xf32> to vector<128x8xf32>
    %17 = arith.addf %14, %16 : vector<128x8xf32>
    %cst_8 = arith.constant 0.000000e+00 : f32
    %18 = vector.broadcast %cst_8 : f32 to vector<128x8xf32>
    %19 = arith.maximumf %17, %18 : vector<128x8xf32>
    %20 = tpu.transpose %19, [1, 0] : vector<128x8xf32> -> vector<8x128xf32>
    %c0_9 = arith.constant 0 : index
    %c0_10 = arith.constant 0 : index
    %c0_11 = arith.constant 0 : index
    %c0_12 = arith.constant 0 : index
    %21 = vector.load %arg5[%c0_9, %c0_10, %c0_11, %c0_12] : memref<1x1x8x128xf32, #tpu.memory_space<vmem>>, vector<1x1x8x128xf32>
    %22 = vector.shape_cast %21 : vector<1x1x8x128xf32> to vector<8x128xf32>
    %23 = vector.shape_cast %20 : vector<8x128xf32> to vector<1x1x8x128xf32>
    tpu.vector_store %arg5[%c0_9, %c0_10, %c0_11, %c0_12], %23 {strides = array<i32>} : memref<1x1x8x128xf32, #tpu.memory_space<vmem>>, vector<1x1x8x128xf32>,
    return
  }
  func.func @transform_0(%arg0: i32, %arg1: i32) -> (i32, i32, i32, i32, i32) {
    %c0_i32 = arith.constant 0 : i32
    %c0_i32_0 = arith.constant 0 : i32
    %c0_i32_1 = arith.constant 0 : i32
    %c0_i32_2 = arith.constant 0 : i32
    return %arg0, %arg1, %c0_i32, %c0_i32_0, %c0_i32_1 : i32, i32, i32, i32, i32
  }
  func.func @transform_1(%arg0: i32, %arg1: i32) -> (i32, i32) {
    %c0_i32 = arith.constant 0 : i32
    %c0_i32_0 = arith.constant 0 : i32
    %c0_i32_1 = arith.constant 0 : i32
    return %c0_i32, %c0_i32_0 : i32, i32
  }
  func.func @transform_2(%arg0: i32, %arg1: i32) -> (i32, i32) {
    %c0_i32 = arith.constant 0 : i32
    %c0_i32_0 = arith.constant 0 : i32
    %c0_i32_1 = arith.constant 0 : i32
    return %c0_i32, %c0_i32_0 : i32, i32
  }
  func.func @transform_3(%arg0: i32, %arg1: i32) -> (i32, i32, i32, i32) {
    %c0_i32 = arith.constant 0 : i32
    %c0_i32_0 = arith.constant 0 : i32
    %c0_i32_1 = arith.constant 0 : i32
    return %arg0, %arg1, %c0_i32, %c0_i32_0 : i32, i32, i32, i32
  }
}

</mosaic_0001>

<bundles_post_ra>
// kernel: conv_relu.1
= control target key start
LH: loop header
LB: loop body
LE: loop exit
PB: predicated region body
PF: predicated region fallthrough
CT: control target
= control target key end

     0   :  { %s1313_s12 = smov 0   ;;  %s1315_s13 = smov 0   ;;  %s2143_s0 = inlined_call_operand.vmem [shape: f32[2,2,10,18,4], index: 0, kind: input, shape index: {}]   ;;  %s2144_s1 = inlined_call_operand.vmem [shape: f32[36,8], index: 1, kind: input, shape index: {}]   ;;  %s2145_s2 = inlined_call_operand.vmem [shape: f32[1,8], index: 2, kind: input, shape index: {}]   ;;  %s2146_s3 = inlined_call_operand.vmem [shape: f32[2,2,8,128], index: 3, kind: output, shape index: {}]  }
   0x1   :  { %s1317_s14 = smov 0   ;;  %s1319_s15 = smov 0  }
   0x2   :  { %s1321_s16 = smov 0  }
   0x3 LB: > { %s22_s17 = sadd.s32 1, %s1275_s14  ;;  %s25_s18 = sadd.s32 1, %s1279_s15  ;;  %s1283_s16 = sphi %s1321_s16, %s13_s16   ;;  %s1279_s15 = sphi %s1319_s15, %s2174_s15   ;;  %s1275_s14 = sphi %s1317_s14, %s2173_s14   ;;  %s1271_s13 = sphi %s1315_s13, %s2172_s13   ;;  %s1267_s12 = sphi %s1313_s12, %s2171_s12  }
   0x4   : > { %p23_p0 = scmp.ge.s32.totalorder %s22_s17, 2  ;;  %p1156_p1 = scmp.ge.s32.totalorder %s1283_s16, 1 }
   0x5   : > { %p157_p2 = scmp.lt.s32.totalorder %s1283_s16, 5 }
   0x6   : > { %s2176_s17 = smov (%p23_p0, %s22_s17), 0  ;;  %s2178_s18 = smov (!%p23_p0, %s25_s18), %s1279_s15 }
   0x7   : > { %p158_p3 = pnand %p1156_p1, %p157_p2  ;;  %p27_p4 = scmp.ge.s32.totalorder %s2178_s18, 2 }
   0x9   : > { %s2180_s18 = smov (%p27_p4, %s2178_s18), 0  ;;  %161 = sbr.rel (%p158_p3) target bundleno = 670 (0x29e), region = 32 }
   0xe   : > { %p188_p5 = scmp.lt.s32.totalorder %s1271_s13, 1  ;;  %p190_p6 = scmp.lt.s32.totalorder %s1267_s12, 1  ;;  %vm259_vm0 = vcmask 1046528   ;;  %vm348_vm1 = vcmask 1045504   ;;  %vm768_vm2 = vcmask 64512   ;;  %vm751_vm3 = vcmask 31744  }
   0xf   : > { %s1285_s26 = smov 4   ;;  %s1286_s27 = smov 8   ;;  %vm785_vm4 = vcmask 97280   ;;  %vm802_vm5 = vcmask 130048   ;;  %vm945_vm6 = vcmask 1043456   ;;  %vm819_vm7 = vcmask 162816  }
  0x10   : > { %s2182_s13 = smov (!%p188_p5, %s1271_s13), 1  ;;  %s2184_s12 = smov (!%p190_p6, %s1267_s12), 1  ;;  %vm836_vm8 = vcmask 195584   ;;  %vm853_vm9 = vcmask 228352   ;;  %vm870_vm10 = vcmask 261120   ;;  %vm896_vm11 = vcmask 293888  }
  0x11   : > { %s1195_s19 = smul.u32 60, %s2182_s13  ;;  %s1287_s28 = smov 12  }
  0x12   : > { %s1194_s20 = smul.u32 30, %s2184_s12  ;;  %s1288_s29 = smov 16  }
  0x13   : > { %s1289_s30 = smov 24   ;;  %s1290_s4 = smov 20  }
  0x14   : > { %s194_s21 = sadd.s32 %s1195_s19, %s1194_s20  ;;  %s1291_s5 = smov 32  }
  0x15   : > { %s1157_s22 = sshll.u32 %s194_s21, 3  ;;  %s1292_s6 = smov 28  }
  0x16   : > { %s1352_s25 = scalar_lea.vmem %s2143_s0, %s1157_s22 }
  0x17   : > { %v1355_v0 = vld [vmem:[%s1352_s25 + $0x30] sm:$0xff]  ;;  %v1358_v1 = vld [vmem:[%s1352_s25 + $0x38] sm:$0xff]  ;;  %v1366_v5 = vld [vmem:[%s1352_s25 + $0x20] sm:$0xff] }
  0x18   : > { %v1361_v2 = vld [vmem:[%s1352_s25 + $0x18] sm:$0xff]  ;;  %v270_v3 = vrot.slane %v1355_v0, 1  ;;  %v271_v4 = vrot.slane %v1358_v1, 1  ;;  %v1370_v7 = vld [vmem:[%s1352_s25] sm:$0xff]  ;;  %v1373_v8 = vld [vmem:[%s1352_s25 + $0x8] sm:$0xff]  ;;  %v266_v9 = vrot.slane %v1366_v5, 1 }
  0x19   : > { %v265_v6 = vrot.slane %v1361_v2, 1  ;;  %v260_v10 = vrot.slane %v1370_v7, 1  ;;  %v261_v11 = vrot.slane %v1373_v8, 1  ;;  %v1379_v12 = vld [vmem:[%s1352_s25 + $0x40] sm:$0x3]  ;;  %v1413_v25 = vld [vmem:[%s1352_s25 + $0x68] sm:$0xff] }
  0x1a   : > { %v1382_v13 = vsel %vm259_vm0, %v270_v3, %v271_v4  ;;  %v1385_v14 = vld [vmem:[%s1352_s25 + $0x28] sm:$0x3]  ;;  %v1388_v15 = vld [vmem:[%s1352_s25 + $0x10] sm:$0x3]  ;;  %v273_v18 = vrot.slane %v1379_v12, 1  ;;  %v1410_v24 = vld [vmem:[%s1352_s25 + $0x60] sm:$0xff] }
  0x1b   : > { %308 = vrot.lane.b32.xlu2 %v1382_v13, %s1285_s26  ;;  %v1393_v16 = vsel %vm259_vm0, %v265_v6, %v266_v9  ;;  %v262_v17 = vsel %vm259_vm0, %v260_v10, %v261_v11  ;;  %v268_v19 = vrot.slane %v1385_v14, 1  ;;  %v263_v20 = vrot.slane %v1388_v15, 1  ;;  %v1416_v26 = vld [vmem:[%s1352_s25 + $0x50] sm:$0xff]  ;;  %v1419_v27 = vld [vmem:[%s1352_s25 + $0x58] sm:$0x3]  ;;  %v1422_v28 = vld [vmem:[%s1352_s25 + $0x48] sm:$0xff] }
  0x1c   : > { %304 = vrot.lane.b32.xlu1 %v1393_v16, %s1285_s26  ;;  %300 = vrot.lane.b32.xlu0 %v262_v17, %s1285_s26  ;;  %v1403_v21 = vsel %vm259_vm0, %v271_v4, %v273_v18  ;;  %v280_v29 = vrot.slane %v1410_v24, 1  ;;  %v281_v30 = vrot.slane %v1413_v25, 1  ;;  %v276_v31 = vrot.slane %v1416_v26, 1  ;;  %v1444_v37 = vld [vmem:[%s1352_s25 + $0x80] sm:$0xff]  ;;  %v1447_v38 = vld [vmem:[%s1352_s25 + $0x88] sm:$0x3] }
  0x1d   : > { %v1406_v22 = vsel %vm259_vm0, %v266_v9, %v268_v19  ;;  %v264_v23 = vsel %vm259_vm0, %v261_v11, %v263_v20  ;;  %v278_v32 = vrot.slane %v1419_v27, 1  ;;  %v275_v33 = vrot.slane %v1422_v28, 1  ;;  %v1450_v39 = vld [vmem:[%s1352_s25 + $0x78] sm:$0xff]  ;;  %v1453_v40 = vld [vmem:[%s1352_s25 + $0x70] sm:$0x3]  ;;  %v1475_v48 = vld [vmem:[%s1352_s25 + $0xa8] sm:$0xff] }
  0x1e   : > { %v1435_v34 = vsel %vm259_vm0, %v280_v29, %v281_v30  ;;  %v286_v41 = vrot.slane %v1444_v37, 1  ;;  %v288_v42 = vrot.slane %v1447_v38, 1  ;;  %v285_v43 = vrot.slane %v1450_v39, 1  ;;  %v1478_v49 = vld [vmem:[%s1352_s25 + $0xb0] sm:$0xff]  ;;  %v1481_v50 = vld [vmem:[%s1352_s25 + $0x98] sm:$0xff] }
  0x1f   : > { %v1438_v35 = vsel %vm259_vm0, %v276_v31, %v278_v32  ;;  %v1441_v36 = vsel %vm259_vm0, %v275_v33, %v276_v31  ;;  %v283_v44 = vrot.slane %v1453_v40, 1  ;;  %v1484_v51 = vld [vmem:[%s1352_s25 + $0xa0] sm:$0x3]  ;;  %v1487_v52 = vld [vmem:[%s1352_s25 + $0x90] sm:$0xff]  ;;  %v295_v53 = vrot.slane %v1475_v48, 1 }
  0x20   : > { %v1466_v45 = vsel %vm259_vm0, %v286_v41, %v288_v42  ;;  %v1469_v46 = vsel %vm259_vm0, %v285_v43, %v286_v41  ;;  %v296_v54 = vrot.slane %v1478_v49, 1  ;;  %v291_v55 = vrot.slane %v1481_v50, 1  ;;  %v1510_v61 = vld [vmem:[%s1352_s25 + $0xb8] sm:$0x3] }
  0x21   : > { %2157 = vst [vmem:[#allocation2_spill] sm:$0xff] %v1466_v45  ;;  %v1472_v47 = vsel %vm259_vm0, %v281_v30, %v283_v44  ;;  %v293_v56 = vrot.slane %v1484_v51, 1  ;;  %v290_v57 = vrot.slane %v1487_v52, 1  ;;  %v350_v62 = vrot.slane %v1373_v8, 2 }
  0x22   : > { %2158 = vst [vmem:[#allocation3_spill] sm:$0xff] %v1469_v46  ;;  %v1501_v58 = vsel %vm259_vm0, %v295_v53, %v296_v54  ;;  %v352_v63 = vrot.slane %v1388_v15, 2  ;;  %v349_v3 = vrot.slane %v1370_v7, 2  ;;  %v298_v4 = vrot.slane %v1510_v61, 1 }
  0x23   : > { %310 = vrot.lane.b32.xlu2 %v1403_v21, %s1285_s26  ;;  %2159 = vst [vmem:[#allocation4_spill] sm:$0xff] %v1501_v58  ;;  %v1504_v59 = vsel %vm259_vm0, %v291_v55, %v293_v56  ;;  %v1507_v60 = vsel %vm259_vm0, %v290_v57, %v291_v55  ;;  %v359_v11 = vrot.slane %v1355_v0, 2  ;;  %v360_v15 = vrot.slane %v1358_v1, 2 }
  0x24   : > { %306 = vrot.lane.b32.xlu1 %v1406_v22, %s1285_s26  ;;  %302 = vrot.lane.b32.xlu0 %v264_v23, %s1285_s26  ;;  %v353_v6 = vsel %vm348_vm1, %v350_v62, %v352_v63  ;;  %v351_v9 = vsel %vm348_vm1, %v349_v3, %v350_v62  ;;  %v1525_v10 = vsel %vm259_vm0, %v296_v54, %v298_v4  ;;  %v355_v17 = vrot.slane %v1366_v5, 2 }
  0x25   : > { %2160 = vst [vmem:[#allocation5_spill] sm:$0xff] %v1525_v10  ;;  %v357_v18 = vrot.slane %v1385_v14, 2  ;;  %v354_v19 = vrot.slane %v1361_v2, 2  ;;  %v1537_v20 = vsel %vm348_vm1, %v359_v11, %v360_v15  ;;  %v365_v14 = vrot.slane %v1416_v26, 2 }
  0x26   : > { %v367_v30 = vrot.slane %v1419_v27, 2  ;;  %v364_v31 = vrot.slane %v1422_v28, 2  ;;  %v362_v32 = vrot.slane %v1379_v12, 2  ;;  %v374_v12 = vrot.slane %v1450_v39, 2 }
  0x27   : > { %v1540_v23 = vsel %vm348_vm1, %v355_v17, %v357_v18  ;;  %v1543_v29 = vsel %vm348_vm1, %v354_v19, %v355_v17  ;;  %v375_v27 = vrot.slane %v1444_v37, 2  ;;  %v370_v43 = vrot.slane %v1413_v25, 2 }
  0x28   : > { %v1556_v33 = vsel %vm348_vm1, %v365_v14, %v367_v30  ;;  %v1559_v41 = vsel %vm348_vm1, %v364_v31, %v365_v14  ;;  %v1562_v42 = vsel %vm348_vm1, %v360_v15, %v362_v32  ;;  %v372_v44 = vrot.slane %v1453_v40, 2  ;;  %v1642_v31 = vld [vmem:[%s1352_s25 + $0xc8] sm:$0xff]  ;;  %v1645_v32 = vld [vmem:[%s1352_s25 + $0xc0] sm:$0xff] }
  0x29   : > { %v369_v53 = vrot.slane %v1410_v24, 2  ;;  %v1576_v54 = vsel %vm348_vm1, %v374_v12, %v375_v27  ;;  %v380_v40 = vrot.slane %v1481_v50, 2  ;;  %v382_v57 = vrot.slane %v1484_v51, 2  ;;  %2163 = vst [vmem:[#allocation8_spill] sm:$0xff] %v1645_v32 }
  0x2a   : > { %v1579_v55 = vsel %vm348_vm1, %v370_v43, %v372_v44  ;;  %v379_v62 = vrot.slane %v1487_v52, 2  ;;  %v377_v63 = vrot.slane %v1447_v38, 2  ;;  %v385_v38 = vrot.slane %v1478_v49, 2 }
  0x2b   : > { %316 = vrot.lane.b32.xlu2 %v1435_v34, %s1285_s26  ;;  %v1582_v56 = vsel %vm348_vm1, %v369_v53, %v370_v43  ;;  %v1595_v3 = vsel %vm348_vm1, %v380_v40, %v382_v57  ;;  %v387_v51 = vrot.slane %v1510_v61, 2 }
  0x2c   : > { %314 = vrot.lane.b32.xlu1 %v1438_v35, %s1285_s26  ;;  %312 = vrot.lane.b32.xlu0 %v1441_v36, %s1285_s26  ;;  %2161 = vst [vmem:[#allocation6_spill] sm:$0xff] %v1595_v3  ;;  %v1598_v4 = vsel %vm348_vm1, %v379_v62, %v380_v40 }
  0x2d   : > { %v1613_v11 = vsel %vm348_vm1, %v385_v38, %v387_v51 }
  0x2e   : > { %2162 = vst [vmem:[#allocation7_spill] sm:$0xff] %v1613_v11 }
  0x33   : > { %322 = vrot.lane.b32.xlu2 %v1466_v45, %s1285_s26 }
  0x34   : > { %320 = vrot.lane.b32.xlu1 %v1469_v46, %s1285_s26  ;;  %318 = vrot.lane.b32.xlu0 %v1472_v47, %s1285_s26 }
  0x3b   : > { %328 = vrot.lane.b32.xlu2 %v1501_v58, %s1285_s26 }
  0x3c   : > { %326 = vrot.lane.b32.xlu1 %v1504_v59, %s1285_s26  ;;  %324 = vrot.lane.b32.xlu0 %v1507_v60, %s1285_s26 }
  0x43   : > { %391 = vrot.lane.b32.xlu2 %v353_v6, %s1286_s27  ;;  %v1601_v6 = vsel %vm348_vm1, %v375_v27, %v377_v63 }
  0x44   : > { %389 = vrot.lane.b32.xlu1 %v351_v9, %s1286_s27  ;;  %330 = vrot.lane.b32.xlu0 %v1525_v10, %s1285_s26  ;;  %v384_v9 = vrot.slane %v1475_v48, 2  ;;  %s1158_s26 = sshll.u32 %s2182_s13, 1 }
  0x46   : > { %v1616_v15 = vsel %vm348_vm1, %v384_v9, %v385_v38 }
  0x4b   : > { %397 = vrot.lane.b32.xlu2 %v1537_v20, %s1286_s27 }
  0x4c   : > { %395 = vrot.lane.b32.xlu1 %v1540_v23, %s1286_s27  ;;  %393 = vrot.lane.b32.xlu0 %v1543_v29, %s1286_s27 }
  0x53   : > { %403 = vrot.lane.b32.xlu2 %v1556_v33, %s1286_s27 }
  0x54   : > { %401 = vrot.lane.b32.xlu1 %v1559_v41, %s1286_s27  ;;  %399 = vrot.lane.b32.xlu0 %v1562_v42, %s1286_s27 }
  0x5b   : > { %409 = vrot.lane.b32.xlu2 %v1576_v54, %s1286_s27 }
  0x5c   : > { %407 = vrot.lane.b32.xlu1 %v1579_v55, %s1286_s27  ;;  %405 = vrot.lane.b32.xlu0 %v1582_v56, %s1286_s27 }
  0x63   : > { %415 = vrot.lane.b32.xlu2 %v1595_v3, %s1286_s27 }
  0x64   : > { %413 = vrot.lane.b32.xlu1 %v1598_v4, %s1286_s27  ;;  %411 = vrot.lane.b32.xlu0 %v1601_v6, %s1286_s27 }
  0x6b   : > { %439 = vrot.lane.b32.xlu2 %v1361_v2, %s1287_s28 }
  0x6c   : > { %419 = vrot.lane.b32.xlu1 %v1613_v11, %s1286_s27  ;;  %417 = vrot.lane.b32.xlu0 %v1616_v15, %s1286_s27  ;;  %s202_s27 = sadd.s32 %s1158_s26, %s2184_s12 }
  0x73   : > { %445 = vrot.lane.b32.xlu2 %v1358_v1, %s1287_s28 }
  0x74   : > { %443 = vrot.lane.b32.xlu1 %v1355_v0, %s1287_s28  ;;  %441 = vrot.lane.b32.xlu0 %v1366_v5, %s1287_s28 }
  0x75   : > { %v309_v61 = vpop.permute.xlu2 %308 }
  0x7b   : > { %451 = vrot.lane.b32.xlu2 %v1410_v24, %s1287_s28 }
  0x7c   : > { %449 = vrot.lane.b32.xlu1 %v1416_v26, %s1287_s28  ;;  %447 = vrot.lane.b32.xlu0 %v1422_v28, %s1287_s28 }
  0x7d   : > { %v1629_v17 = vpop.permute.xlu2 %310 }
  0x83   : > { %457 = vrot.lane.b32.xlu2 %v1444_v37, %s1287_s28 }
  0x84   : > { %455 = vrot.lane.b32.xlu1 %v1450_v39, %s1287_s28  ;;  %453 = vrot.lane.b32.xlu0 %v1413_v25, %s1287_s28 }
  0x85   : > { %v1634_v18 = vpop.permute.xlu2 %316 }
  0x8b   : > { %463 = vrot.lane.b32.xlu2 %v1475_v48, %s1287_s28 }
  0x8c   : > { %461 = vrot.lane.b32.xlu1 %v1481_v50, %s1287_s28  ;;  %459 = vrot.lane.b32.xlu0 %v1487_v52, %s1287_s28 }
  0x8d   : > { %v1639_v19 = vpop.permute.xlu2 %322 }
  0x8e   : > { %v305_v14 = vpop.permute.xlu1 %304  ;;  %v301_v30 = vpop.permute.xlu0 %300 }
  0x93   : > { %469 = vrot.lane.b32.xlu2 %v1642_v31, %s1287_s28 }
  0x94   : > { %467 = vrot.lane.b32.xlu1 %v1645_v32, %s1287_s28  ;;  %465 = vrot.lane.b32.xlu0 %v1478_v49, %s1287_s28  ;;  %s1159_s28 = sshll.u32 %s202_s27, 3 }
  0x95   : > { %v1650_v12 = vpop.permute.xlu2 %328 }
  0x96   : > { %v307_v27 = vpop.permute.xlu1 %306  ;;  %v303_v43 = vpop.permute.xlu0 %302 }
  0x97   : > { %v753_v44 = vsel %vm751_vm3, %v1373_v8, %v303_v43 }
  0x9b   : > { %497 = vrot.lane.b32.xlu2 %v1382_v13, %s1288_s29 }
  0x9c   : > { %495 = vrot.lane.b32.xlu1 %v1406_v22, %s1288_s29  ;;  %493 = vrot.lane.b32.xlu0 %v1393_v16, %s1288_s29  ;;  %v756_v16 = vsel %vm751_vm3, %v1355_v0, %v309_v61 }
  0x9d   : > { %v392_v53 = vpop.permute.xlu2 %391 }
  0x9e   : > { %v315_v40 = vpop.permute.xlu1 %314  ;;  %v1661_v57 = vsel %vm768_vm2, %v753_v44, %v392_v53  ;;  %v313_v62 = vpop.permute.xlu0 %312  ;;  %v488_v53 = vrot.slane %v1645_v32, 1  ;;  %v1705_v32 = vld [vmem:[%s1352_s25 + $0xd0] sm:$0x3] }
  0x9f   : > { %v759_v51 = vsel %vm751_vm3, %v1416_v26, %v315_v40  ;;  %v489_v40 = vrot.slane %v1642_v31, 1 }
  0xa3   : > { %503 = vrot.lane.b32.xlu2 %v1438_v35, %s1288_s29 }
  0xa4   : > { %501 = vrot.lane.b32.xlu1 %v1441_v36, %s1288_s29  ;;  %499 = vrot.lane.b32.xlu0 %v1403_v21, %s1288_s29 }
  0xa5   : > { %v398_v22 = vpop.permute.xlu2 %397 }
  0xa6   : > { %v321_v8 = vpop.permute.xlu1 %320  ;;  %v1672_v63 = vsel %vm768_vm2, %v756_v16, %v398_v22  ;;  %v319_v38 = vpop.permute.xlu0 %318 }
  0xa7   : > { %v762_v16 = vsel %vm751_vm3, %v1450_v39, %v321_v8  ;;  %v754_v8 = vsel %vm751_vm3, %v1361_v2, %v305_v14  ;;  %v758_v14 = vsel %vm751_vm3, %v1422_v28, %v313_v62  ;;  %v761_v62 = vsel %vm751_vm3, %v1413_v25, %v319_v38 }
  0xab   : > { %509 = vrot.lane.b32.xlu2 %v1469_v46, %s1288_s29 }
  0xac   : > { %507 = vrot.lane.b32.xlu1 %v1472_v47, %s1288_s29  ;;  %505 = vrot.lane.b32.xlu0 %v1435_v34, %s1288_s29 }
  0xad   : > { %v404_v9 = vpop.permute.xlu2 %403 }
  0xae   : > { %v327_v61 = vpop.permute.xlu1 %326  ;;  %v1683_v43 = vsel %vm768_vm2, %v759_v51, %v404_v9  ;;  %v325_v44 = vpop.permute.xlu0 %324  ;;  %v752_v51 = vsel %vm751_vm3, %v1370_v7, %v301_v30 }
  0xaf   : > { %v765_v7 = vsel %vm751_vm3, %v1481_v50, %v327_v61 }
  0xb3   : > { %515 = vrot.lane.b32.xlu2 %v1504_v59, %s1288_s29 }
  0xb4   : > { %513 = vrot.lane.b32.xlu1 %v1507_v60, %s1288_s29  ;;  %511 = vrot.lane.b32.xlu0 %v1466_v45, %s1288_s29  ;;  %v1702_v45 = vsel %vm259_vm0, %v488_v53, %v489_v40  ;;  %v755_v53 = vsel %vm751_vm3, %v1366_v5, %v307_v27  ;;  %v757_v5 = vsel %vm751_vm3, %v1358_v1, %v1629_v17 }
  0xb5   : > { %v410_v22 = vpop.permute.xlu2 %409 }
  0xb6   : > { %v1698_v9 = vsel %vm768_vm2, %v762_v16, %v410_v22  ;;  %v390_v11 = vpop.permute.xlu1 %389  ;;  %v331_v46 = vpop.permute.xlu0 %330 }
  0xb7   : > { %v769_v3 = vsel %vm768_vm2, %v752_v51, %v390_v11  ;;  %v491_v11 = vrot.slane %v1705_v32, 1 }
  0xb9   : > { %v1726_v61 = vsel %vm259_vm0, %v489_v40, %v491_v11 }
  0xbb   : > { %521 = vrot.lane.b32.xlu2 %v1702_v45, %s1288_s29 }
  0xbc   : > { %519 = vrot.lane.b32.xlu1 %v1525_v10, %s1288_s29  ;;  %517 = vrot.lane.b32.xlu0 %v1501_v58, %s1288_s29 }
  0xbd   : > { %v416_v30 = vpop.permute.xlu2 %415 }
  0xbe   : > { %v1721_v16 = vsel %vm768_vm2, %v765_v7, %v416_v30  ;;  %v396_v22 = vpop.permute.xlu1 %395  ;;  %v394_v51 = vpop.permute.xlu0 %393 }
  0xbf   : > { %v772_v10 = vsel %vm768_vm2, %v755_v53, %v396_v22  ;;  %v771_v58 = vsel %vm768_vm2, %v754_v8, %v394_v51 }
  0xc3   : > { %596 = vrot.lane.b32.xlu2 %v1355_v0, %s1289_s30 }
  0xc4   : > { %546 = vrot.lane.b32.xlu1 %v1543_v29, %s1290_s4  ;;  %523 = vrot.lane.b32.xlu0 %v1726_v61, %s1288_s29 }
  0xc5   : > { %v440_v2 = vpop.permute.xlu2 %439 }
  0xc6   : > { %v1740_v27 = vsel %vm785_vm4, %v769_v3, %v440_v2  ;;  %v402_v0 = vpop.permute.xlu1 %401  ;;  %v400_v40 = vpop.permute.xlu0 %399  ;;  %v760_v3 = vsel %vm751_vm3, %v1410_v24, %v1634_v18  ;;  %v764_v18 = vsel %vm751_vm3, %v1487_v52, %v325_v44  ;;  %v767_v44 = vsel %vm751_vm3, %v1478_v49, %v331_v46 }
  0xc7   : > { %v775_v7 = vsel %vm768_vm2, %v758_v14, %v402_v0  ;;  %v774_v29 = vsel %vm768_vm2, %v757_v5, %v400_v40 }
  0xcb   : > { %548 = vrot.lane.b32.xlu2 %v1540_v23, %s1290_s4 }
  0xcc   : > { %703 = vrot.lane.b32.xlu1 %v1537_v20, %s1291_s5  ;;  %650 = vrot.lane.b32.xlu0 %v1382_v13, %s1292_s6 }
  0xcd   : > { %v446_v17 = vpop.permute.xlu2 %445 }
  0xce   : > { %v1756_v30 = vsel %vm785_vm4, %v772_v10, %v446_v17  ;;  %v408_v23 = vpop.permute.xlu1 %407  ;;  %v406_v11 = vpop.permute.xlu0 %405  ;;  %v763_v10 = vsel %vm751_vm3, %v1444_v37, %v1639_v19  ;;  %v766_v19 = vsel %vm751_vm3, %v1475_v48, %v1650_v12 }
  0xcf   : > { %v778_v8 = vsel %vm768_vm2, %v761_v62, %v408_v23  ;;  %v777_v53 = vsel %vm768_vm2, %v760_v3, %v406_v11 }
  0xd3   : > { %705 = vrot.lane.b32.xlu2 %v1562_v42, %s1291_s5 }
  0xd4   : > { %652 = vrot.lane.b32.xlu1 %v1403_v21, %s1292_s6  ;;  %598 = vrot.lane.b32.xlu0 %v1358_v1, %s1289_s30 }
  0xd5   : > { %v452_v13 = vpop.permute.xlu2 %451 }
  0xd6   : > { %v1772_v38 = vsel %vm785_vm4, %v775_v7, %v452_v13  ;;  %v414_v22 = vpop.permute.xlu1 %413  ;;  %v412_v51 = vpop.permute.xlu0 %411 }
  0xd7   : > { %v781_v2 = vsel %vm768_vm2, %v764_v18, %v414_v22  ;;  %v780_v21 = vsel %vm768_vm2, %v763_v10, %v412_v51 }
  0xdb   : > { %658 = vrot.lane.b32.xlu2 %v1435_v34, %s1292_s6 }
  0xdc   : > { %604 = vrot.lane.b32.xlu1 %v1410_v24, %s1289_s30  ;;  %554 = vrot.lane.b32.xlu0 %v1559_v41, %s1290_s4 }
  0xdd   : > { %v458_v1 = vpop.permute.xlu2 %457 }
  0xde   : > { %v1788_v5 = vsel %vm785_vm4, %v778_v8, %v458_v1  ;;  %v420_v14 = vpop.permute.xlu1 %419  ;;  %v418_v0 = vpop.permute.xlu0 %417 }
  0xdf   : > { %v784_v34 = vsel %vm768_vm2, %v767_v44, %v420_v14  ;;  %v783_v24 = vsel %vm768_vm2, %v766_v19, %v418_v0  ;;  %v888_v44 = vld [vmem:[%s2144_s1 + $0x8] sm:$0xff] }
  0xe3   : > { %600 = vrot.lane.b32.xlu2 %v1422_v28, %s1289_s30 }
  0xe4   : > { %550 = vrot.lane.b32.xlu1 %v1537_v20, %s1290_s4  ;;  %711 = vrot.lane.b32.xlu0 %v1582_v56, %s1291_s5 }
  0xe5   : > { %v464_v12 = vpop.permute.xlu2 %463 }
  0xe6   : > { %v1799_v46 = vsel %vm785_vm4, %v781_v2, %v464_v12  ;;  %v444_v40 = vpop.permute.xlu1 %443  ;;  %v442_v7 = vpop.permute.xlu0 %441 }
  0xe7   : > { %v788_v17 = vsel %vm785_vm4, %v771_v58, %v444_v40  ;;  %v1804_v3 = vsel %vm785_vm4, %v1661_v57, %v442_v7  ;;  %v2165_v40 = vld [vmem:[#allocation8_spill] sm:$0xff] }
  0xeb   : > { %612 = vrot.lane.b32.xlu2 %v1487_v52, %s1289_s30 }
  0xec   : > { %654 = vrot.lane.b32.xlu1 %v1441_v36, %s1292_s6  ;;  %562 = vrot.lane.b32.xlu0 %v1576_v54, %s1290_s4 }
  0xed   : > { %v470_v28 = vpop.permute.xlu2 %469 }
  0xee   : > { %v1813_v20 = vsel %vm785_vm4, %v784_v34, %v470_v28  ;;  %v450_v62 = vpop.permute.xlu1 %449  ;;  %v448_v23 = vpop.permute.xlu0 %447  ;;  %v542_v28 = vrot.slane %v1642_v31, 2 }
  0xef   : > { %v791_v58 = vsel %vm785_vm4, %v774_v29, %v450_v62  ;;  %v1818_v57 = vsel %vm785_vm4, %v1672_v63, %v448_v23 }
  0xf3   : > { %666 = vrot.lane.b32.xlu2 %v1507_v60, %s1292_s6 }
  0xf4   : > { %556 = vrot.lane.b32.xlu1 %v1556_v33, %s1290_s4  ;;  %707 = vrot.lane.b32.xlu0 %v1559_v41, %s1291_s5 }
  0xf5   : > { %v498_v36 = vpop.permute.xlu2 %497 }
  0xf6   : > { %v1827_v52 = vsel %vm802_vm5, %v788_v17, %v498_v36  ;;  %v456_v11 = vpop.permute.xlu1 %455  ;;  %v454_v29 = vpop.permute.xlu0 %453  ;;  %v541_v17 = vrot.slane %v2165_v40, 2 }
  0xf7   : > { %v794_v8 = vsel %vm785_vm4, %v777_v53, %v456_v11  ;;  %v793_v63 = vsel %vm785_vm4, %v1683_v43, %v454_v29 }
  0xf8   : > { %v1933_v36 = vsel %vm348_vm1, %v541_v17, %v542_v28 }
  0xfb   : > { %660 = vrot.lane.b32.xlu2 %v1472_v47, %s1292_s6 }
  0xfc   : > { %719 = vrot.lane.b32.xlu1 %v1598_v4, %s1291_s5  ;;  %606 = vrot.lane.b32.xlu0 %v1413_v25, %s1289_s30 }
  0xfd   : > { %v504_v60 = vpop.permute.xlu2 %503 }
  0xfe   : > { %v1839_v41 = vsel %vm802_vm5, %v791_v58, %v504_v60  ;;  %v462_v13 = vpop.permute.xlu1 %461  ;;  %v460_v10 = vpop.permute.xlu0 %459  ;;  %v2167_v60 = vld [vmem:[#allocation4_spill] sm:$0xff] }
  0xff   : > { %v797_v53 = vsel %vm785_vm4, %v780_v21, %v462_v13  ;;  %v1844_v43 = vsel %vm785_vm4, %v1698_v9, %v460_v10 }
 0x103   : > { %602 = vrot.lane.b32.xlu2 %v1416_v26, %s1289_s30 }
 0x104   : > { %552 = vrot.lane.b32.xlu1 %v1562_v42, %s1290_s4  ;;  %713 = vrot.lane.b32.xlu0 %v1579_v55, %s1291_s5 }
 0x105   : > { %v510_v25 = vpop.permute.xlu2 %509 }
 0x106   : > { %v1853_v47 = vsel %vm802_vm5, %v794_v8, %v510_v25  ;;  %v468_v18 = vpop.permute.xlu1 %467  ;;  %v466_v22 = vpop.permute.xlu0 %465 }
 0x107   : > { %v800_v51 = vsel %vm785_vm4, %v783_v24, %v468_v18  ;;  %v1858_v9 = vsel %vm785_vm4, %v1721_v16, %v466_v22 }
 0x10b   : > { %614 = vrot.lane.b32.xlu2 %v1481_v50, %s1289_s30 }
 0x10c   : > { %656 = vrot.lane.b32.xlu1 %v1438_v35, %s1292_s6  ;;  %564 = vrot.lane.b32.xlu0 %v1601_v6, %s1290_s4 }
 0x10d   : > { %v516_v26 = vpop.permute.xlu2 %515 }
 0x10e   : > { %v1867_v42 = vsel %vm802_vm5, %v797_v53, %v516_v26  ;;  %v1869_v2 = vpop.permute.xlu1 %495  ;;  %v1871_v21 = vpop.permute.xlu0 %493 }
 0x113   : > { %668 = vrot.lane.b32.xlu2 %v1504_v59, %s1292_s6  ;;  %v891_v59 = vld [vmem:[%s2144_s1 + $0x20] sm:$0xf] }
 0x114   : > { %558 = vrot.lane.b32.xlu1 %v1582_v56, %s1290_s4  ;;  %709 = vrot.lane.b32.xlu0 %v1556_v33, %s1291_s5  ;;  %v890_v33 = vld [vmem:[%s2144_s1 + $0x18] sm:$0xff]  ;;  %v889_v56 = vld [vmem:[%s2144_s1 + $0x10] sm:$0xff] }
 0x115   : > { %v522_v35 = vpop.permute.xlu2 %521  ;;  %1160 = vmatpush.msk.msra.mxu0 %vm945_vm6, %v891_v59  ;;  %1179 = vmatpush.msk.msra.mxu1 %vm945_vm6, %v891_v59 }
 0x116   : > { %v1880_v50 = vsel %vm802_vm5, %v800_v51, %v522_v35  ;;  %v1882_v16 = vpop.permute.xlu1 %501  ;;  %v500_v1 = vpop.permute.xlu0 %499  ;;  %1180 = vmatpush.msk.msra.mxu2 %vm945_vm6, %v891_v59  ;;  %1181 = vmatpush.msk.msra.mxu3 %vm945_vm6, %v891_v59  ;;  %v544_v51 = vrot.slane %v1705_v32, 2 }
 0x117   : > { %v1886_v19 = vsel %vm802_vm5, %v1756_v30, %v500_v1  ;;  %961 = vmatpush.msra.mxu0 %v890_v33  ;;  %1182 = vmatpush.msra.mxu1 %v890_v33  ;;  %v2164_v30 = vld [vmem:[#allocation6_spill] sm:$0xff] }
 0x118   : > { %1183 = vmatpush.msra.mxu2 %v890_v33  ;;  %1184 = vmatpush.msra.mxu3 %v890_v33  ;;  %v545_v1 = vsel %vm348_vm1, %v542_v28, %v544_v51 }
 0x119   : > { %962 = vmatpush.msra.mxu0 %v889_v56  ;;  %1185 = vmatpush.msra.mxu1 %v889_v56 }
 0x11a   : > { %1186 = vmatpush.msra.mxu2 %v889_v56  ;;  %1187 = vmatpush.msra.mxu3 %v889_v56 }
 0x11b   : > { %570 = vrot.lane.b32.xlu2 %v1616_v15, %s1290_s4  ;;  %963 = vmatpush.msra.mxu0 %v888_v44 }
 0x11c   : > { %721 = vrot.lane.b32.xlu1 %v2164_v30, %s1291_s5  ;;  %608 = vrot.lane.b32.xlu0 %v1450_v39, %s1289_s30  ;;  %v887_v39 = vld [vmem:[%s2144_s1] sm:$0xff] }
 0x11d   : > { %v597_v14 = vpop.permute.xlu2 %596  ;;  %1188 = vmatpush.msra.mxu1 %v888_v44  ;;  %1189 = vmatpush.msra.mxu2 %v888_v44 }
 0x11e   : > { %v508_v0 = vpop.permute.xlu1 %507  ;;  %v506_v34 = vpop.permute.xlu0 %505  ;;  %964 = vmatpush.msra.mxu0 %v887_v39  ;;  %1190 = vmatpush.msra.mxu3 %v888_v44  ;;  %v232_v44 = vld [vmem:[%s1352_s25 + $0xd8] sm:$0xff] }
 0x11f   : > { %v1907_v24 = vsel %vm802_vm5, %v793_v63, %v508_v0  ;;  %v1911_v12 = vsel %vm802_vm5, %v1772_v38, %v506_v34  ;;  %1191 = vmatpush.msra.mxu1 %v887_v39  ;;  %1192 = vmatpush.msra.mxu2 %v887_v39  ;;  %v2166_v38 = vld [vmem:[#allocation3_spill] sm:$0xff] }
 0x120   : > { %1193 = vmatpush.msra.mxu3 %v887_v39 }
 0x123   : > { %715 = vrot.lane.b32.xlu2 %v1576_v54, %s1291_s5 }
 0x124   : > { %620 = vrot.lane.b32.xlu1 %v2165_v40, %s1289_s30  ;;  %662 = vrot.lane.b32.xlu0 %v2166_v38, %s1292_s6 }
 0x125   : > { %v549_v7 = vpop.permute.xlu2 %548 }
 0x126   : > { %v514_v62 = vpop.permute.xlu1 %513  ;;  %v512_v23 = vpop.permute.xlu0 %511 }
 0x127   : > { %v1926_v58 = vsel %vm802_vm5, %v1844_v43, %v514_v62  ;;  %v1930_v54 = vsel %vm802_vm5, %v1788_v5, %v512_v23  ;;  %v2168_v43 = vld [vmem:[#allocation7_spill] sm:$0xff] }
 0x12b   : > { %566 = vrot.lane.b32.xlu2 %v1598_v4, %s1290_s4 }
 0x12c   : > { %727 = vrot.lane.b32.xlu1 %v1933_v36, %s1291_s5  ;;  %674 = vrot.lane.b32.xlu0 %v1702_v45, %s1292_s6 }
 0x12d   : > { %v706_v11 = vpop.permute.xlu2 %705 }
 0x12e   : > { %v520_v29 = vpop.permute.xlu1 %519  ;;  %v518_v8 = vpop.permute.xlu0 %517 }
 0x12f   : > { %v1943_v63 = vsel %vm802_vm5, %v1858_v9, %v520_v29  ;;  %v1947_v5 = vsel %vm802_vm5, %v1799_v46, %v518_v8  ;;  %v803_v46 = vsel %vm802_vm5, %v1740_v27, %v1871_v21 }
 0x133   : > { %670 = vrot.lane.b32.xlu2 %v2167_v60, %s1292_s6 }
 0x134   : > { %560 = vrot.lane.b32.xlu1 %v1579_v55, %s1290_s4  ;;  %616 = vrot.lane.b32.xlu0 %v1475_v48, %s1289_s30 }
 0x135   : > { %v659_v45 = vpop.permute.xlu2 %658 }
 0x136   : > { %v547_v4 = vpop.permute.xlu1 %546  ;;  %v524_v13 = vpop.permute.xlu0 %523 }
 0x137   : > { %v1957_v10 = vsel %vm802_vm5, %v1813_v20, %v524_v13  ;;  %v820_v53 = vsel %vm819_vm7, %v803_v46, %v547_v4 }
 0x138   : > { %v837_v20 = vsel %vm836_vm8, %v820_v53, %v597_v14  ;;  %v233_v14 = vld [vmem:[%s1352_s25 + $0xe0] sm:$0xff] }
 0x13b   : > { %572 = vrot.lane.b32.xlu2 %v2168_v43, %s1290_s4 }
 0x13c   : > { %723 = vrot.lane.b32.xlu1 %v1616_v15, %s1291_s5  ;;  %610 = vrot.lane.b32.xlu0 %v1444_v37, %s1289_s30  ;;  %v2169_v37 = vld [vmem:[#allocation2_spill] sm:$0xff]  ;;  %v804_v15 = vsel %vm802_vm5, %v1804_v3, %v1869_v2  ;;  %v807_v2 = vsel %vm802_vm5, %v1818_v57, %v1882_v16  ;;  %v646_v16 = vrot.slane %v233_v14, 1 }
 0x13d   : > { %v601_v48 = vpop.permute.xlu2 %600  ;;  %v821_v9 = vsel %vm819_vm7, %v804_v15, %v549_v7  ;;  %v699_v7 = vrot.slane %v233_v14, 2 }
 0x13e   : > { %v704_v55 = vpop.permute.xlu1 %703  ;;  %v651_v27 = vpop.permute.xlu0 %650 }
 0x13f   : > { %v854_v25 = vsel %vm853_vm9, %v837_v20, %v651_v27 }
 0x140   : > { %v871_v18 = vsel %vm870_vm10, %v854_v25, %v704_v55 }
 0x141   : > { %1161 = vmatmul.msk.f32.vlgmr.msra.gmra.mxu0 %vm896_vm11, %v871_v18 }
 0x143   : > { %717 = vrot.lane.b32.xlu2 %v1601_v6, %s1291_s5 }
 0x144   : > { %622 = vrot.lane.b32.xlu1 %v1642_v31, %s1289_s30  ;;  %664 = vrot.lane.b32.xlu0 %v2169_v37, %s1292_s6 }
 0x145   : > { %v613_v22 = vpop.permute.xlu2 %612 }
 0x146   : > { %v653_v26 = vpop.permute.xlu1 %652  ;;  %v599_v21 = vpop.permute.xlu0 %598 }
 0x147   : > { %v838_v6 = vsel %vm836_vm8, %v821_v9, %v599_v21 }
 0x148   : > { %v855_v35 = vsel %vm853_vm9, %v838_v6, %v653_v26 }
 0x149   : > { %v872_v31 = vsel %vm870_vm10, %v855_v35, %v706_v11  ;;  %v234_v11 = vld [vmem:[%s1352_s25 + $0xe8] sm:$0x3] }
 0x14a   : > { %1162 = vmatmul.msk.f32.gmra.mxu0 %vm896_vm11, %v872_v31  ;;  %v701_v60 = vrot.slane %v234_v11, 2 }
 0x14b   : > { %568 = vrot.lane.b32.xlu2 %v2164_v30, %s1290_s4  ;;  %v2170_v30 = vld [vmem:[#allocation5_spill] sm:$0xff] }
 0x14c   : > { %729 = vrot.lane.b32.xlu1 %v545_v1, %s1291_s5  ;;  %676 = vrot.lane.b32.xlu0 %v1726_v61, %s1292_s6  ;;  %v645_v61 = vrot.slane %v232_v44, 1 }
 0x14d   : > { %v667_v59 = vpop.permute.xlu2 %666 }
 0x14e   : > { %v605_v32 = vpop.permute.xlu1 %604  ;;  %v555_v3 = vpop.permute.xlu0 %554  ;;  %v647_v40 = vsel %vm259_vm0, %v645_v61, %v646_v16 }
 0x14f   : > { %v824_v33 = vsel %vm819_vm7, %v807_v2, %v555_v3 }
 0x150   : > { %v841_v56 = vsel %vm836_vm8, %v824_v33, %v605_v32 }
 0x151   : > { %v858_v57 = vsel %vm853_vm9, %v841_v56, %v659_v45 }
 0x153   : > { %725 = vrot.lane.b32.xlu2 %v2168_v43, %s1291_s5  ;;  %v702_v43 = vsel %vm348_vm1, %v699_v7, %v701_v60 }
 0x154   : > { %672 = vrot.lane.b32.xlu1 %v2170_v30, %s1292_s6  ;;  %618 = vrot.lane.b32.xlu0 %v1478_v49, %s1289_s30  ;;  %v698_v49 = vrot.slane %v232_v44, 2 }
 0x155   : > { %v661_v38 = vpop.permute.xlu2 %660 }
 0x156   : > { %v551_v0 = vpop.permute.xlu1 %550  ;;  %v712_v34 = vpop.permute.xlu0 %711  ;;  %v700_v62 = vsel %vm348_vm1, %v698_v49, %v699_v7 }
 0x157   : > { %v875_v39 = vsel %vm870_vm10, %v858_v57, %v712_v34  ;;  %v822_v23 = vsel %vm819_vm7, %v1827_v52, %v551_v0 }
 0x158   : > { %1165 = vmatmul.msk.f32.vlgmr.msra.gmra.mxu1 %vm896_vm11, %v875_v39  ;;  %v839_v8 = vsel %vm836_vm8, %v822_v23, %v601_v48 }
 0x15b   : > { %678 = vrot.lane.b32.xlu2 %v647_v40, %s1292_s6 }
 0x15c   : > { %624 = vrot.lane.b32.xlu1 %v232_v44, %s1289_s30  ;;  %574 = vrot.lane.b32.xlu0 %v1933_v36, %s1290_s4  ;;  %v648_v36 = vrot.slane %v234_v11, 1 }
 0x15d   : > { %v603_v29 = vpop.permute.xlu2 %602 }
 0x15e   : > { %v655_v17 = vpop.permute.xlu1 %654  ;;  %v563_v28 = vpop.permute.xlu0 %562  ;;  %v649_v53 = vsel %vm259_vm0, %v646_v16, %v648_v36 }
 0x15f   : > { %v856_v45 = vsel %vm853_vm9, %v839_v8, %v655_v17  ;;  %v828_v52 = vsel %vm819_vm7, %v1853_v47, %v563_v28 }
 0x160   : > { %v845_v55 = vsel %vm836_vm8, %v828_v52, %v613_v22 }
 0x161   : > { %v862_v25 = vsel %vm853_vm9, %v845_v55, %v667_v59  ;;  %v2081_v55 = vld [vmem:[%s2145_s2] ss:$0 sm:$0xff] }
 0x163   : > { %626 = vrot.lane.b32.xlu2 %v233_v14, %s1289_s30 }
 0x164   : > { %576 = vrot.lane.b32.xlu1 %v545_v1, %s1290_s4  ;;  %731 = vrot.lane.b32.xlu0 %v700_v62, %s1291_s5  ;;  %s204_s4 = scalar_lea.vmem %s2146_s3, %s1159_s28 }
 0x165   : > { %v615_v48 = vpop.permute.xlu2 %614 }
 0x166   : > { %v557_v4 = vpop.permute.xlu1 %556  ;;  %v708_v13 = vpop.permute.xlu0 %707 }
 0x167   : > { %v873_v46 = vsel %vm870_vm10, %v856_v45, %v708_v13  ;;  %v825_v47 = vsel %vm819_vm7, %v1839_v41, %v557_v4 }
 0x168   : > { %1163 = vmatmul.msk.f32.gmra.mxu0 %vm896_vm11, %v873_v46 }
 0x16c   : > { %680 = vrot.lane.b32.xlu0 %v649_v53, %s1292_s6  ;;  %733 = vrot.lane.b32.xlu1 %v702_v43, %s1291_s5 }
 0x16d   : > { %v669_v9 = vpop.permute.xlu2 %668 }
 0x16e   : > { %v720_v20 = vpop.permute.xlu1 %719  ;;  %v607_v27 = vpop.permute.xlu0 %606 }
 0x16f   : > { %v879_v18 = vsel %vm870_vm10, %v862_v25, %v720_v20  ;;  %v842_v37 = vsel %vm836_vm8, %v825_v47, %v607_v27 }
 0x170   : > { %1169 = vmatmul.msk.f32.vlgmr.msra.gmra.mxu2 %vm896_vm11, %v879_v18  ;;  %v859_v51 = vsel %vm853_vm9, %v842_v37, %v661_v38 }
 0x175   : > { %v571_v35 = vpop.permute.xlu2 %570 }
 0x176   : > { %v553_v15 = vpop.permute.xlu1 %552  ;;  %v714_v22 = vpop.permute.xlu0 %713  ;;  %v832_v40 = vsel %vm819_vm7, %v1947_v5, %v571_v35 }
 0x177   : > { %v876_v26 = vsel %vm870_vm10, %v859_v51, %v714_v22  ;;  %v823_v31 = vsel %vm819_vm7, %v1886_v19, %v553_v15 }
 0x178   : > { %1166 = vmatmul.msk.f32.gmra.mxu1 %vm896_vm11, %v876_v26  ;;  %v840_v1 = vsel %vm836_vm8, %v823_v31, %v603_v29 }
 0x17d   : > { %v716_v33 = vpop.permute.xlu2 %715 }
 0x17e   : > { %v657_v21 = vpop.permute.xlu1 %656  ;;  %v565_v6 = vpop.permute.xlu0 %564 }
 0x17f   : > { %v857_v41 = vsel %vm853_vm9, %v840_v1, %v657_v21  ;;  %v829_v59 = vsel %vm819_vm7, %v1930_v54, %v565_v6 }
 0x180   : > { %v846_v56 = vsel %vm836_vm8, %v829_v59, %v615_v48 }
 0x181   : > { %v863_v19 = vsel %vm853_vm9, %v846_v56, %v669_v9 }
 0x185   : > { %v567_v14 = vpop.permute.xlu2 %566 }
 0x186   : > { %v559_v32 = vpop.permute.xlu1 %558  ;;  %v710_v3 = vpop.permute.xlu0 %709  ;;  %v830_v29 = vsel %vm819_vm7, %v1926_v58, %v567_v14 }
 0x187   : > { %v874_v2 = vsel %vm870_vm10, %v857_v41, %v710_v3  ;;  %v826_v0 = vsel %vm819_vm7, %v1911_v12, %v559_v32 }
 0x188   : > { %1164 = vmatmul.msk.f32.gmra.mxu0 %vm896_vm11, %v874_v2 }
 0x18d   : > { %v671_v17 = vpop.permute.xlu2 %670 }
 0x18e   : > { %v722_v44 = vpop.permute.xlu1 %721  ;;  %v609_v30 = vpop.permute.xlu0 %608 }
 0x18f   : > { %v880_v61 = vsel %vm870_vm10, %v863_v19, %v722_v44  ;;  %v843_v34 = vsel %vm836_vm8, %v826_v0, %v609_v30 }
 0x190   : > { %1170 = vmatmul.msk.f32.gmra.mxu2 %vm896_vm11, %v880_v61 }
 0x195   : > { %v573_v11 = vpop.permute.xlu2 %572 }
 0x196   : > { %v621_v54 = vpop.permute.xlu1 %620  ;;  %v663_v57 = vpop.permute.xlu0 %662  ;;  %v833_v20 = vsel %vm819_vm7, %v1943_v63, %v573_v11 }
 0x197   : > { %v860_v16 = vsel %vm853_vm9, %v843_v34, %v663_v57  ;;  %v849_v38 = vsel %vm836_vm8, %v832_v40, %v621_v54 }
 0x198   : > { %v877_v39 = vsel %vm870_vm10, %v860_v16, %v716_v33 }
 0x199   : > { %1167 = vmatmul.msk.f32.gmra.mxu1 %vm896_vm11, %v877_v39 }
 0x19d   : > { %v718_v4 = vpop.permute.xlu2 %717 }
 0x19e   : > { %v728_v49 = vpop.permute.xlu1 %727  ;;  %v675_v7 = vpop.permute.xlu0 %674 }
 0x19f   : > { %v866_v12 = vsel %vm853_vm9, %v849_v38, %v675_v7 }
 0x1a0   : > { %v883_v28 = vsel %vm870_vm10, %v866_v12, %v728_v49 }
 0x1a1   : > { %1173 = vmatmul.msk.f32.vlgmr.msra.gmra.mxu3 %vm896_vm11, %v883_v28 }
 0x1a5   : > { %v569_v48 = vpop.permute.xlu2 %568 }
 0x1a6   : > { %v561_v62 = vpop.permute.xlu1 %560  ;;  %v617_v23 = vpop.permute.xlu0 %616  ;;  %v831_v63 = vsel %vm819_vm7, %v1867_v42, %v569_v48 }
 0x1a7   : > { %v847_v8 = vsel %vm836_vm8, %v830_v29, %v617_v23  ;;  %v827_v13 = vsel %vm819_vm7, %v1907_v24, %v561_v62 }
 0x1a8   : > { %v864_v60 = vsel %vm853_vm9, %v847_v8, %v671_v17 }
 0x1ad   : > { %v726_v9 = vpop.permute.xlu2 %725 }
 0x1ae   : > { %v724_v5 = vpop.permute.xlu1 %723  ;;  %v611_v36 = vpop.permute.xlu0 %610 }
 0x1af   : > { %v881_v45 = vsel %vm870_vm10, %v864_v60, %v724_v5  ;;  %v844_v46 = vsel %vm836_vm8, %v827_v13, %v611_v36 }
 0x1b0   : > { %1171 = vmatmul.msk.f32.gmra.mxu2 %vm896_vm11, %v881_v45 }
 0x1b5   : > { %v679_v42 = vpop.permute.xlu2 %678 }
 0x1b6   : > { %v623_v52 = vpop.permute.xlu1 %622  ;;  %v665_v53 = vpop.permute.xlu0 %664 }
 0x1b7   : > { %v861_v58 = vsel %vm853_vm9, %v844_v46, %v665_v53  ;;  %v850_v25 = vsel %vm836_vm8, %v833_v20, %v623_v52 }
 0x1b8   : > { %v878_v43 = vsel %vm870_vm10, %v861_v58, %v718_v4 }
 0x1b9   : > { %1168 = vmatmul.msk.f32.gmra.mxu1 %vm896_vm11, %v878_v43 }
 0x1bd   : > { %v627_v61 = vpop.permute.xlu2 %626 }
 0x1be   : > { %v730_v24 = vpop.permute.xlu1 %729  ;;  %v966_v27 = vpop.f32.mrf.mxu0 }
 0x1bf   : > { %v967_v18 = vadd.f32 %v2081_v55, %v966_v27  ;;  %v677_v47 = vpop.permute.xlu0 %676 }
 0x1c0   : > { %v867_v37 = vsel %vm853_vm9, %v850_v25, %v677_v47 }
 0x1c1   : > { %v1014_v15 = vmax.f32 %v967_v18, 0.0  ;;  %v884_v22 = vsel %vm870_vm10, %v867_v37, %v730_v24 }
 0x1c2   : > { %1174 = vmatmul.msk.f32.gmra.mxu3 %vm896_vm11, %v884_v22 }
 0x1c3   : > { %1030 = vxpose.xlu2.b32.start [1/16] (narrow) %v1014_v15, 8 }
 0x1c6   : > { %v673_v51 = vpop.permute.xlu1 %672 }
 0x1c7   : > { %v619_v26 = vpop.permute.xlu0 %618  ;;  %v969_v21 = vpop.f32.mrf.mxu0 }
 0x1c8   : > { %v848_v6 = vsel %vm836_vm8, %v831_v63, %v619_v26  ;;  %v970_v35 = vadd.f32 %v2081_v55, %v969_v21 }
 0x1c9   : > { %v865_v31 = vsel %vm853_vm9, %v848_v6, %v673_v51 }
 0x1ca   : > { %v1015_v1 = vmax.f32 %v970_v35, 0.0  ;;  %v882_v41 = vsel %vm870_vm10, %v865_v31, %v726_v9 }
 0x1cb   : > { %1172 = vmatmul.msk.f32.gmra.mxu2 %vm896_vm11, %v882_v41 }
 0x1cc   : > { %1031 = vxpose.xlu2.b32.cont [2/16] (narrow) %v1015_v1, 8 }
 0x1ce   : > { %v625_v32 = vpop.permute.xlu1 %624 }
 0x1cf   : > { %v575_v3 = vpop.permute.xlu0 %574 }
 0x1d0   : > { %v834_v2 = vsel %vm819_vm7, %v1880_v50, %v575_v3 }
 0x1d1   : > { %v851_v59 = vsel %vm836_vm8, %v834_v2, %v625_v32 }
 0x1d2   : > { %v868_v56 = vsel %vm853_vm9, %v851_v59, %v679_v42 }
 0x1d5   : > { %v978_v49 = vpop.f32.mrf.mxu1 }
 0x1d6   : > { %v577_v33 = vpop.permute.xlu1 %576  ;;  %v979_v7 = vadd.f32 %v2081_v55, %v978_v49 }
 0x1d7   : > { %v732_v44 = vpop.permute.xlu0 %731  ;;  %v835_v19 = vsel %vm819_vm7, %v1957_v10, %v577_v33 }
 0x1d8   : > { %v885_v30 = vsel %vm870_vm10, %v868_v56, %v732_v44  ;;  %v852_v0 = vsel %vm836_vm8, %v835_v19, %v627_v61  ;;  %v1018_v17 = vmax.f32 %v979_v7, 0.0 }
 0x1d9   : > { %1175 = vmatmul.msk.f32.gmra.mxu3 %vm896_vm11, %v885_v30 }
 0x1de   : > { %v734_v14 = vpop.permute.xlu1 %733 }
 0x1df   : > { %v681_v34 = vpop.permute.xlu0 %680 }
 0x1e0   : > { %v869_v50 = vsel %vm853_vm9, %v852_v0, %v681_v34 }
 0x1e1   : > { %v886_v54 = vsel %vm870_vm10, %v869_v50, %v734_v14 }
 0x1e2   : > { %1176 = vmatmul.msk.f32.gmra.mxu3 %vm896_vm11, %v886_v54 }
 0x1e5   : > { %v972_v57 = vpop.f32.mrf.mxu0 }
 0x1e6   : > { %v973_v16 = vadd.f32 %v2081_v55, %v972_v57 }
 0x1e8   : > { %v1016_v39 = vmax.f32 %v973_v16, 0.0 }
 0x1ea   : > { %1032 = vxpose.xlu2.b32.cont [3/16] (narrow) %v1016_v39, 8 }
 0x1f3   : > { %v990_v60 = vpop.f32.mrf.mxu2 }
 0x1f4   : > { %v991_v45 = vadd.f32 %v2081_v55, %v990_v60 }
 0x1f5   : > { %v981_v12 = vpop.f32.mrf.mxu1 }
 0x1f6   : > { %v982_v28 = vadd.f32 %v2081_v55, %v981_v12  ;;  %v1022_v4 = vmax.f32 %v991_v45, 0.0 }
 0x1f8   : > { %v1019_v62 = vmax.f32 %v982_v28, 0.0 }
 0x205   : > { %v975_v40 = vpop.f32.mrf.mxu0 }
 0x206   : > { %v976_v38 = vadd.f32 %v2081_v55, %v975_v40 }
 0x208   : > { %v1017_v10 = vmax.f32 %v976_v38, 0.0 }
 0x20a   : > { %1033 = vxpose.xlu2.b32.cont [4/16] (narrow) %v1017_v10, 8 }
 0x212   : > { %1034 = vxpose.xlu2.b32.cont [5/16] (narrow) %v1018_v17, 8 }
 0x213   : > { %v993_v13 = vpop.f32.mrf.mxu2 }
 0x214   : > { %v994_v46 = vadd.f32 %v2081_v55, %v993_v13 }
 0x216   : > { %v984_v23 = vpop.f32.mrf.mxu1  ;;  %v1023_v52 = vmax.f32 %v994_v46, 0.0 }
 0x217   : > { %v985_v11 = vadd.f32 %v2081_v55, %v984_v23 }
 0x219   : > { %v1020_v29 = vmax.f32 %v985_v11, 0.0 }
 0x21a   : > { %1035 = vxpose.xlu2.b32.cont [6/16] (narrow) %v1019_v62, 8 }
 0x222   : > { %1036 = vxpose.xlu2.b32.cont [7/16] (narrow) %v1020_v29, 8 }
 0x224   : > { %v1002_v24 = vpop.f32.mrf.mxu3 }
 0x225   : > { %v1003_v25 = vadd.f32 %v2081_v55, %v1002_v24 }
 0x227   : > { %v1026_v47 = vmax.f32 %v1003_v25, 0.0 }
 0x233   : > { %v996_v53 = vpop.f32.mrf.mxu2 }
 0x234   : > { %v997_v58 = vadd.f32 %v2081_v55, %v996_v53 }
 0x236   : > { %v987_v8 = vpop.f32.mrf.mxu1  ;;  %v1024_v43 = vmax.f32 %v997_v58, 0.0 }
 0x237   : > { %v988_v5 = vadd.f32 %v2081_v55, %v987_v8 }
 0x239   : > { %v1021_v36 = vmax.f32 %v988_v5, 0.0 }
 0x23b   : > { %1037 = vxpose.xlu2.b32.cont [8/16] (narrow) %v1021_v36, 8 }
 0x243   : > { %1038 = vxpose.xlu2.b32.cont [9/16] (narrow) %v1022_v4, 8 }
 0x245   : > { %v1005_v18 = vpop.f32.mrf.mxu3 }
 0x246   : > { %v1006_v37 = vadd.f32 %v2081_v55, %v1005_v18 }
 0x248   : > { %v1027_v22 = vmax.f32 %v1006_v37, 0.0 }
 0x24b   : > { %1039 = vxpose.xlu2.b32.cont [10/16] (narrow) %v1023_v52, 8 }
 0x24e   : > { %v999_v48 = vpop.f32.mrf.mxu2 }
 0x24f   : > { %v1000_v20 = vadd.f32 %v2081_v55, %v999_v48 }
 0x251   : > { %v1025_v27 = vmax.f32 %v1000_v20, 0.0 }
 0x253   : > { %1040 = vxpose.xlu2.b32.cont [11/16] (narrow) %v1024_v43, 8 }
 0x25b   : > { %1041 = vxpose.xlu2.b32.cont [12/16] (narrow) %v1025_v27, 8 }
 0x25c   : > { %v1008_v15 = vpop.f32.mrf.mxu3 }
 0x25d   : > { %v1009_v51 = vadd.f32 %v2081_v55, %v1008_v15 }
 0x25f   : > { %v1028_v9 = vmax.f32 %v1009_v51, 0.0 }
 0x263   : > { %1042 = vxpose.xlu2.b32.cont [13/16] (narrow) %v1026_v47, 8 }
 0x265   : > { %v1011_v63 = vpop.f32.mrf.mxu3 }
 0x266   : > { %v1012_v26 = vadd.f32 %v2081_v55, %v1011_v63 }
 0x268   : > { %v1029_v21 = vmax.f32 %v1012_v26, 0.0 }
 0x26b   : > { %1043 = vxpose.xlu2.b32.cont [14/16] (narrow) %v1027_v22, 8 }
 0x273   : > { %1044 = vxpose.xlu2.b32.cont [15/16] (narrow) %v1028_v9, 8 }
 0x27b   : > { %1045 = vxpose.xlu2.b32.end [16/16] (narrow) %v1029_v21, 8 }
 0x29c   : > { %v1046_v6 = vpop.trf.xlu2 }
 0x29d   : > { %1062 = vst [vmem:[%s204_s4] sm:$0xff] %v1046_v6 }
 0x29e PF: > { %s13_s16 = sadd.s32 1, %s1283_s16   ;;  %s2171_s12 = smov %s1275_s14 }
 0x29f   : > { %p10_p7 = scmp.ge.s32.totalorder %s13_s16, 6   ;;  %s2172_s13 = smov %s1279_s15 }
 0x2a0   : > { %s2173_s14 = smov %s2176_s17  ;;  %s2174_s15 = smov %s2180_s18 }
 0x2a1   :  { %12 = sbr.rel (!%p10_p7) target bundleno = 3 (0x3), region = 62 }

</bundles_post_ra>
